<compile_context>
chip_gen: v7x
topology: tpu7x:2x2x1
jax: 0.10.0
libtpu: 0.0.40
codegen_flags: <defaults>
</compile_context>

<pallas_src>
import math

import jax
import jax.numpy as jnp
from jax.experimental import pallas as pl

D_MODEL = 32
NUM_HEADS = 4
D_K = D_MODEL // NUM_HEADS
SCALE = math.sqrt(D_K)
INV_SCALE = 1.0 / SCALE


# ----------------------------- Pallas kernel -----------------------------
def mha_kernel(q_ref, k_ref, v_ref, qkv_w_ref, qkv_b_ref, wo_ref, bo_ref, o_ref):
    B, Sq, D = q_ref.shape
    Skv = k_ref.shape[1]
    H, dk = NUM_HEADS, D_K
    Mq, Mkv = B * Sq, B * Skv

    # Fold batch into the matmul M dimension; feed the MXU bf16 operands.
    q2 = q_ref[...].reshape(Mq, D).astype(jnp.bfloat16)
    k2 = k_ref[...].reshape(Mkv, D).astype(jnp.bfloat16)
    v2 = v_ref[...].reshape(Mkv, D).astype(jnp.bfloat16)

    wq = qkv_w_ref[0]          # (D, D) bf16, 1/sqrt(d_k) folded in host-side
    wk = qkv_w_ref[1]
    wv = qkv_w_ref[2]
    bq = qkv_b_ref[0]          # (1, D) f32, 1/sqrt(d_k) folded in host-side
    bk = qkv_b_ref[1]
    bv = qkv_b_ref[2]
    wo = wo_ref[...]           # (D, D) bf16 (original flat W_o)
    bo = bo_ref[...]           # (1, D) f32

    # Flat full-width projections: one (M, 32) @ (32, 32) matmul each,
    # f32 accumulation, f32 bias add.
    qp = jnp.dot(q2, wq, preferred_element_type=jnp.float32) + bq   # (Mq, D)
    kp = jnp.dot(k2, wk, preferred_element_type=jnp.float32) + bk   # (Mkv, D)
    vp = jnp.dot(v2, wv, preferred_element_type=jnp.float32) + bv   # (Mkv, D)

    def split_heads(x, seq):
        # (B*seq, H*dk) -> (H*B, seq, dk): static lane slices + leading-dim
        # stack + tile-aligned reshape (seq == 8 == f32 sublane tile).
        heads = jnp.stack([x[:, h * dk:(h + 1) * dk] for h in range(H)])  # (H, B*seq, dk)
        return heads.reshape(H * B, seq, dk)

    qh = split_heads(qp, Sq).astype(jnp.bfloat16)    # (H*B, Sq, dk)
    kh = split_heads(kp, Skv).astype(jnp.bfloat16)   # (H*B, Skv, dk)
    vh = split_heads(vp, Skv).astype(jnp.bfloat16)   # (H*B, Skv, dk)

    # Scaled dot-product attention over all (head, batch) pairs as one leading
    # batch dim; softmax math stays f32.
    scores = jnp.einsum("nqd,nkd->nqk", qh, kh,
                        preferred_element_type=jnp.float32)       # (H*B, Sq, Skv)
    mx = jnp.max(scores, axis=-1, keepdims=True)
    e = jnp.exp(scores - mx)
    denom = jnp.sum(e, axis=-1, keepdims=True) + 1e-9             # +1e-9 as in the torch module
    w = e * pl.reciprocal(denom, approx=True)
    ctx = jnp.einsum("nqk,nkd->nqd", w.astype(jnp.bfloat16), vh,
                     preferred_element_type=jnp.float32)          # (H*B, Sq, dk)

    # Merge heads back to (Mq, D) with lane order (h, dk) — matching W_o's row
    # order — then ONE flat (Mq, 32) @ (32, 32) output matmul (no per-head
    # matmuls, no head-sum, no live (H, Mq, D) temporaries).
    ctx_h = ctx.reshape(H, Mq, dk)
    ctx_flat = jnp.concatenate([ctx_h[h] for h in range(H)], axis=-1)   # (Mq, D)
    out = jnp.dot(ctx_flat.astype(jnp.bfloat16), wo,
                  preferred_element_type=jnp.float32) + bo              # (Mq, D)

    o_ref[...] = out.astype(o_ref.dtype)


def multi_head_attention(q, k, v, packed_params):
    """q: (B, Sq, D); k, v: (B, Skv, D). mask is not supported (see TODO above)."""
    B, Sq, D = q.shape
    qkv_w, qkv_b, wo, bo = packed_params
    out2d = pl.pallas_call(
        mha_kernel,
        out_shape=jax.ShapeDtypeStruct((B * Sq, D), jnp.float32),
    )(q, k, v, qkv_w, qkv_b, wo, bo)
    return out2d.reshape(B, Sq, D)


# --------------------- parameter construction / packing ---------------------
def xavier_uniform(key, fan_in, fan_out):
    limit = math.sqrt(6.0 / (fan_in + fan_out))
    # stored as (in, out) == W.T of the torch nn.Linear weight, so y = x @ W + b
    return jax.random.uniform(key, (fan_in, fan_out), jnp.float32, -limit, limit)


def make_params(key):
    kq, kk, kv, ko = jax.random.split(key, 4)
    wq = xavier_uniform(kq, D_MODEL, D_MODEL)
    wk = xavier_uniform(kk, D_MODEL, D_MODEL)
    wv = xavier_uniform(kv, D_MODEL, D_MODEL)
    wo = xavier_uniform(ko, D_MODEL, D_MODEL)
    zero = jnp.zeros((D_MODEL,), jnp.float32)  # the torch module zero-inits biases
    return (wq, zero, wk, zero, wv, zero, wo, zero)


def pack_params(wq, bq, wk, bk, wv, bv, wo, bo):
    """Host-side packing: fold 1/sqrt(d_k) into the Q projection params, stack
    Q/K/V params into single arrays (fewer DMA descriptors / double-buffers),
    and cast MXU weights to bf16 (biases stay f32 for the f32 adds)."""
    qkv_w = jnp.stack([wq * INV_SCALE, wk, wv]).astype(jnp.bfloat16)     # (3, D, D) bf16
    qkv_b = jnp.stack([bq * INV_SCALE, bk, bv]).reshape(3, 1, D_MODEL)   # (3, 1, D) f32
    return qkv_w, qkv_b, wo.astype(jnp.bfloat16), bo.reshape(1, D_MODEL)


# -------------------------- pure-JAX reference --------------------------
def reference(q, k, v, flat_params):
    """Mirror of the torch module's forward (mask=None), all f32."""
    wq, bq, wk, bk, wv, bv, wo, bo = flat_params
    B, Sq, D = q.shape
    Skv = k.shape[1]

    def split(x, s):
        return x.reshape(B, s, NUM_HEADS, D_K).transpose(0, 2, 1, 3)

    Q = split(q @ wq + bq, Sq)
    K = split(k @ wk + bk, Skv)
    V = split(v @ wv + bv, Skv)
    scores = jnp.einsum("bhqd,bhkd->bhqk", Q, K) / SCALE
    mx = scores.max(-1, keepdims=True)
    e = jnp.exp(scores - mx)
    attn = e / (e.sum(-1, keepdims=True) + 1e-9)
    ctx = jnp.einsum("bhqk,bhkd->bhqd", attn, V)
    ctx = ctx.transpose(0, 2, 1, 3).reshape(B, Sq, D)
    return ctx @ wo + bo


if __name__ == "__main__":
    key = jax.random.PRNGKey(0)
    kq, kk, kv, kp = jax.random.split(key, 4)

    B, SQ, SKV = 2, 8, 8
    q = jax.random.normal(kq, (B, SQ, D_MODEL), jnp.float32)
    k = jax.random.normal(kk, (B, SKV, D_MODEL), jnp.float32)
    v = jax.random.normal(kv, (B, SKV, D_MODEL), jnp.float32)

    flat = make_params(kp)
    packed = pack_params(*flat)

    out = multi_head_attention(q, k, v, packed)
    out = jax.block_until_ready(out)

    ref = reference(q, k, v, flat)
    assert out.shape == (B, SQ, D_MODEL)
    # bf16 MXU operands (f32 accumulation) + approx reciprocal -> tolerance is
    # widened vs the pure-f32 path; semantics are unchanged.
    assert jnp.allclose(out, ref, atol=2e-2, rtol=2e-2), "mismatch vs JAX reference"

    print("KERNEL_OK")
</pallas_src>

<mosaic_0001>
module attributes {stable_mosaic.version = 11 : i64} {
  func.func @mha_kernel(%arg0: memref<2x8x32xf32, #tpu.memory_space<vmem>>, %arg1: memref<2x8x32xf32, #tpu.memory_space<vmem>>, %arg2: memref<2x8x32xf32, #tpu.memory_space<vmem>>, %arg3: memref<3x32x32xbf16, #tpu.memory_space<vmem>>, %arg4: memref<3x1x32xf32, #tpu.memory_space<vmem>>, %arg5: memref<32x32xbf16, #tpu.memory_space<vmem>>, %arg6: memref<1x32xf32, #tpu.memory_space<vmem>>, %arg7: memref<16x32xf32, #tpu.memory_space<vmem>>) attributes {dimension_semantics = [], scalar_prefetch = 0 : i64, scratch_operands = 0 : i64, tpu.core_type = #tpu.core_type<tc>} {
    %c0 = arith.constant 0 : index
    %c0_0 = arith.constant 0 : index
    %c0_1 = arith.constant 0 : index
    %0 = vector.load %arg0[%c0, %c0_0, %c0_1] : memref<2x8x32xf32, #tpu.memory_space<vmem>>, vector<2x8x32xf32>
    %1 = vector.shape_cast %0 : vector<2x8x32xf32> to vector<16x32xf32>
    %2 = arith.truncf %1 : vector<16x32xf32> to vector<16x32xbf16>
    %c0_2 = arith.constant 0 : index
    %c0_3 = arith.constant 0 : index
    %c0_4 = arith.constant 0 : index
    %3 = vector.load %arg1[%c0_2, %c0_3, %c0_4] : memref<2x8x32xf32, #tpu.memory_space<vmem>>, vector<2x8x32xf32>
    %4 = vector.shape_cast %3 : vector<2x8x32xf32> to vector<16x32xf32>
    %5 = arith.truncf %4 : vector<16x32xf32> to vector<16x32xbf16>
    %c0_5 = arith.constant 0 : index
    %c0_6 = arith.constant 0 : index
    %c0_7 = arith.constant 0 : index
    %6 = vector.load %arg2[%c0_5, %c0_6, %c0_7] : memref<2x8x32xf32, #tpu.memory_space<vmem>>, vector<2x8x32xf32>
    %7 = vector.shape_cast %6 : vector<2x8x32xf32> to vector<16x32xf32>
    %8 = arith.truncf %7 : vector<16x32xf32> to vector<16x32xbf16>
    %c0_8 = arith.constant 0 : index
    %c0_9 = arith.constant 0 : index
    %c0_10 = arith.constant 0 : index
    %9 = vector.load %arg3[%c0_8, %c0_9, %c0_10] : memref<3x32x32xbf16, #tpu.memory_space<vmem>>, vector<1x32x32xbf16>
    %10 = vector.shape_cast %9 : vector<1x32x32xbf16> to vector<32x32xbf16>
    %c1 = arith.constant 1 : index
    %c0_11 = arith.constant 0 : index
    %c0_12 = arith.constant 0 : index
    %11 = vector.load %arg3[%c1, %c0_11, %c0_12] : memref<3x32x32xbf16, #tpu.memory_space<vmem>>, vector<1x32x32xbf16>
    %12 = vector.shape_cast %11 : vector<1x32x32xbf16> to vector<32x32xbf16>
    %c2 = arith.constant 2 : index
    %c0_13 = arith.constant 0 : index
    %c0_14 = arith.constant 0 : index
    %13 = vector.load %arg3[%c2, %c0_13, %c0_14] : memref<3x32x32xbf16, #tpu.memory_space<vmem>>, vector<1x32x32xbf16>
    %14 = vector.shape_cast %13 : vector<1x32x32xbf16> to vector<32x32xbf16>
    %c0_15 = arith.constant 0 : index
    %c0_16 = arith.constant 0 : index
    %c0_17 = arith.constant 0 : index
    %15 = vector.load %arg4[%c0_15, %c0_16, %c0_17] : memref<3x1x32xf32, #tpu.memory_space<vmem>>, vector<1x1x32xf32>
    %16 = vector.shape_cast %15 : vector<1x1x32xf32> to vector<1x32xf32>
    %c1_18 = arith.constant 1 : index
    %c0_19 = arith.constant 0 : index
    %c0_20 = arith.constant 0 : index
    %17 = vector.load %arg4[%c1_18, %c0_19, %c0_20] : memref<3x1x32xf32, #tpu.memory_space<vmem>>, vector<1x1x32xf32>
    %18 = vector.shape_cast %17 : vector<1x1x32xf32> to vector<1x32xf32>
    %c2_21 = arith.constant 2 : index
    %c0_22 = arith.constant 0 : index
    %c0_23 = arith.constant 0 : index
    %19 = vector.load %arg4[%c2_21, %c0_22, %c0_23] : memref<3x1x32xf32, #tpu.memory_space<vmem>>, vector<1x1x32xf32>
    %20 = vector.shape_cast %19 : vector<1x1x32xf32> to vector<1x32xf32>
    %c0_24 = arith.constant 0 : index
    %c0_25 = arith.constant 0 : index
    %21 = vector.load %arg5[%c0_24, %c0_25] : memref<32x32xbf16, #tpu.memory_space<vmem>>, vector<32x32xbf16>
    %c0_26 = arith.constant 0 : index
    %c0_27 = arith.constant 0 : index
    %22 = vector.load %arg6[%c0_26, %c0_27] : memref<1x32xf32, #tpu.memory_space<vmem>>, vector<1x32xf32>
    %cst = arith.constant dense<0.000000e+00> : vector<16x32xf32>
    %23 = tpu.matmul %2, %10, %cst {dimension_numbers = #tpu.dot_dimension_numbers<[1], [0], [0], [1], [0, 0, 1, 1], [], []>} : vector<16x32xbf16>, vector<32x32xbf16>, vector<16x32xf32> -> vector<16x32xf32>
    %24 = vector.broadcast %16 : vector<1x32xf32> to vector<16x32xf32>
    %25 = arith.addf %23, %24 : vector<16x32xf32>
    %cst_28 = arith.constant dense<0.000000e+00> : vector<16x32xf32>
    %26 = tpu.matmul %5, %12, %cst_28 {dimension_numbers = #tpu.dot_dimension_numbers<[1], [0], [0], [1], [0, 0, 1, 1], [], []>} : vector<16x32xbf16>, vector<32x32xbf16>, vector<16x32xf32> -> vector<16x32xf32>
    %27 = vector.broadcast %18 : vector<1x32xf32> to vector<16x32xf32>
    %28 = arith.addf %26, %27 : vector<16x32xf32>
    %cst_29 = arith.constant dense<0.000000e+00> : vector<16x32xf32>
    %29 = tpu.matmul %8, %14, %cst_29 {dimension_numbers = #tpu.dot_dimension_numbers<[1], [0], [0], [1], [0, 0, 1, 1], [], []>} : vector<16x32xbf16>, vector<32x32xbf16>, vector<16x32xf32> -> vector<16x32xf32>
    %30 = vector.broadcast %20 : vector<1x32xf32> to vector<16x32xf32>
    %31 = arith.addf %29, %30 : vector<16x32xf32>
    %32 = vector.extract_strided_slice %25 {offsets = [0, 0], sizes = [16, 8], strides = [1, 1]} : vector<16x32xf32> to vector<16x8xf32>
    %33 = vector.extract_strided_slice %25 {offsets = [0, 8], sizes = [16, 8], strides = [1, 1]} : vector<16x32xf32> to vector<16x8xf32>
    %34 = vector.extract_strided_slice %25 {offsets = [0, 16], sizes = [16, 8], strides = [1, 1]} : vector<16x32xf32> to vector<16x8xf32>
    %35 = vector.extract_strided_slice %25 {offsets = [0, 24], sizes = [16, 8], strides = [1, 1]} : vector<16x32xf32> to vector<16x8xf32>
    %36 = vector.shape_cast %32 : vector<16x8xf32> to vector<1x16x8xf32>
    %37 = vector.shape_cast %33 : vector<16x8xf32> to vector<1x16x8xf32>
    %38 = vector.shape_cast %34 : vector<16x8xf32> to vector<1x16x8xf32>
    %39 = vector.shape_cast %35 : vector<16x8xf32> to vector<1x16x8xf32>
    %40 = tpu.concatenate %36, %37, %38, %39 in 0 : vector<1x16x8xf32>, vector<1x16x8xf32>, vector<1x16x8xf32>, vector<1x16x8xf32> -> vector<4x16x8xf32>
    %41 = vector.shape_cast %40 : vector<4x16x8xf32> to vector<8x8x8xf32>
    %42 = arith.truncf %41 : vector<8x8x8xf32> to vector<8x8x8xbf16>
    %43 = vector.extract_strided_slice %28 {offsets = [0, 0], sizes = [16, 8], strides = [1, 1]} : vector<16x32xf32> to vector<16x8xf32>
    %44 = vector.extract_strided_slice %28 {offsets = [0, 8], sizes = [16, 8], strides = [1, 1]} : vector<16x32xf32> to vector<16x8xf32>
    %45 = vector.extract_strided_slice %28 {offsets = [0, 16], sizes = [16, 8], strides = [1, 1]} : vector<16x32xf32> to vector<16x8xf32>
    %46 = vector.extract_strided_slice %28 {offsets = [0, 24], sizes = [16, 8], strides = [1, 1]} : vector<16x32xf32> to vector<16x8xf32>
    %47 = vector.shape_cast %43 : vector<16x8xf32> to vector<1x16x8xf32>
    %48 = vector.shape_cast %44 : vector<16x8xf32> to vector<1x16x8xf32>
    %49 = vector.shape_cast %45 : vector<16x8xf32> to vector<1x16x8xf32>
    %50 = vector.shape_cast %46 : vector<16x8xf32> to vector<1x16x8xf32>
    %51 = tpu.concatenate %47, %48, %49, %50 in 0 : vector<1x16x8xf32>, vector<1x16x8xf32>, vector<1x16x8xf32>, vector<1x16x8xf32> -> vector<4x16x8xf32>
    %52 = vector.shape_cast %51 : vector<4x16x8xf32> to vector<8x8x8xf32>
    %53 = arith.truncf %52 : vector<8x8x8xf32> to vector<8x8x8xbf16>
    %54 = vector.extract_strided_slice %31 {offsets = [0, 0], sizes = [16, 8], strides = [1, 1]} : vector<16x32xf32> to vector<16x8xf32>
    %55 = vector.extract_strided_slice %31 {offsets = [0, 8], sizes = [16, 8], strides = [1, 1]} : vector<16x32xf32> to vector<16x8xf32>
    %56 = vector.extract_strided_slice %31 {offsets = [0, 16], sizes = [16, 8], strides = [1, 1]} : vector<16x32xf32> to vector<16x8xf32>
    %57 = vector.extract_strided_slice %31 {offsets = [0, 24], sizes = [16, 8], strides = [1, 1]} : vector<16x32xf32> to vector<16x8xf32>
    %58 = vector.shape_cast %54 : vector<16x8xf32> to vector<1x16x8xf32>
    %59 = vector.shape_cast %55 : vector<16x8xf32> to vector<1x16x8xf32>
    %60 = vector.shape_cast %56 : vector<16x8xf32> to vector<1x16x8xf32>
    %61 = vector.shape_cast %57 : vector<16x8xf32> to vector<1x16x8xf32>
    %62 = tpu.concatenate %58, %59, %60, %61 in 0 : vector<1x16x8xf32>, vector<1x16x8xf32>, vector<1x16x8xf32>, vector<1x16x8xf32> -> vector<4x16x8xf32>
    %63 = vector.shape_cast %62 : vector<4x16x8xf32> to vector<8x8x8xf32>
    %64 = arith.truncf %63 : vector<8x8x8xf32> to vector<8x8x8xbf16>
    "tpu.trace_start"() <{level = 10 : i32, message = "nqd,nkd->nqk"}> : () -> ()
    %cst_30 = arith.constant dense<0.000000e+00> : vector<8x8x8xf32>
    %65 = tpu.matmul %42, %53, %cst_30 {dimension_numbers = #tpu.dot_dimension_numbers<[2], [2], [1], [1], [0, 0, 0, 1, 1, 1], [0], [0]>} : vector<8x8x8xbf16>, vector<8x8x8xbf16>, vector<8x8x8xf32> -> vector<8x8x8xf32>
    "tpu.trace_stop"() : () -> ()
    %cst_31 = arith.constant dense<0xFF800000> : vector<8x8xf32>
    %66 = vector.multi_reduction <maximumf>, %65, %cst_31 [2] : vector<8x8x8xf32> to vector<8x8xf32>
    %67 = vector.shape_cast %66 : vector<8x8xf32> to vector<8x8x1xf32>
    %68 = vector.broadcast %67 : vector<8x8x1xf32> to vector<8x8x8xf32>
    %69 = arith.subf %65, %68 : vector<8x8x8xf32>
    %70 = math.exp %69 : vector<8x8x8xf32>
    %cst_32 = arith.constant dense<0.000000e+00> : vector<8x8xf32>
    %71 = vector.multi_reduction <add>, %70, %cst_32 [2] : vector<8x8x8xf32> to vector<8x8xf32>
    %72 = vector.shape_cast %71 : vector<8x8xf32> to vector<8x8x1xf32>
    %cst_33 = arith.constant 9.99999971E-10 : f32
    %73 = vector.broadcast %cst_33 : f32 to vector<8x8x1xf32>
    %74 = arith.addf %72, %73 : vector<8x8x1xf32>
    %75 = tpu.reciprocal %74 {approx = true} : vector<8x8x1xf32> -> vector<8x8x1xf32>
    %76 = vector.broadcast %75 : vector<8x8x1xf32> to vector<8x8x8xf32>
    %77 = arith.mulf %70, %76 : vector<8x8x8xf32>
    %78 = arith.truncf %77 : vector<8x8x8xf32> to vector<8x8x8xbf16>
    "tpu.trace_start"() <{level = 10 : i32, message = "nqk,nkd->nqd"}> : () -> ()
    %cst_34 = arith.constant dense<0.000000e+00> : vector<8x8x8xf32>
    %79 = tpu.matmul %78, %64, %cst_34 {dimension_numbers = #tpu.dot_dimension_numbers<[2], [1], [1], [2], [0, 0, 0, 1, 1, 2], [0], [0]>} : vector<8x8x8xbf16>, vector<8x8x8xbf16>, vector<8x8x8xf32> -> vector<8x8x8xf32>
    "tpu.trace_stop"() : () -> ()
    %80 = vector.shape_cast %79 : vector<8x8x8xf32> to vector<4x16x8xf32>
    %81 = vector.extract_strided_slice %80 {offsets = [0, 0, 0], sizes = [1, 16, 8], strides = [1, 1, 1]} : vector<4x16x8xf32> to vector<1x16x8xf32>
    %82 = vector.shape_cast %81 : vector<1x16x8xf32> to vector<16x8xf32>
    %83 = vector.extract_strided_slice %80 {offsets = [1, 0, 0], sizes = [1, 16, 8], strides = [1, 1, 1]} : vector<4x16x8xf32> to vector<1x16x8xf32>
    %84 = vector.shape_cast %83 : vector<1x16x8xf32> to vector<16x8xf32>
    %85 = vector.extract_strided_slice %80 {offsets = [2, 0, 0], sizes = [1, 16, 8], strides = [1, 1, 1]} : vector<4x16x8xf32> to vector<1x16x8xf32>
    %86 = vector.shape_cast %85 : vector<1x16x8xf32> to vector<16x8xf32>
    %87 = vector.extract_strided_slice %80 {offsets = [3, 0, 0], sizes = [1, 16, 8], strides = [1, 1, 1]} : vector<4x16x8xf32> to vector<1x16x8xf32>
    %88 = vector.shape_cast %87 : vector<1x16x8xf32> to vector<16x8xf32>
    %89 = tpu.concatenate %82, %84, %86, %88 in 1 : vector<16x8xf32>, vector<16x8xf32>, vector<16x8xf32>, vector<16x8xf32> -> vector<16x32xf32>
    %90 = arith.truncf %89 : vector<16x32xf32> to vector<16x32xbf16>
    %cst_35 = arith.constant dense<0.000000e+00> : vector<16x32xf32>
    %91 = tpu.matmul %90, %21, %cst_35 {dimension_numbers = #tpu.dot_dimension_numbers<[1], [0], [0], [1], [0, 0, 1, 1], [], []>} : vector<16x32xbf16>, vector<32x32xbf16>, vector<16x32xf32> -> vector<16x32xf32>
    %92 = vector.broadcast %22 : vector<1x32xf32> to vector<16x32xf32>
    %93 = arith.addf %91, %92 : vector<16x32xf32>
    %c0_36 = arith.constant 0 : index
    %c0_37 = arith.constant 0 : index
    %94 = vector.load %arg7[%c0_36, %c0_37] : memref<16x32xf32, #tpu.memory_space<vmem>>, vector<16x32xf32>
    tpu.vector_store %arg7[%c0_36, %c0_37], %93 {strides = array<i32>} : memref<16x32xf32, #tpu.memory_space<vmem>>, vector<16x32xf32>,
    return
  }
}

</mosaic_0001>

<bundles_post_ra>
// kernel: tpu_custom_call.1
= control target key start
LH: loop header
LB: loop body
LE: loop exit
PB: predicated region body
PF: predicated region fallthrough
CT: control target
= control target key end

     0   :  { %12 = vsyncpa [#allocation3], 0  ;;  %s2157_s0 = inlined_call_operand.hbm [shape: f32[2,8,32], index: 0, kind: input, shape index: {}]   ;;  %s2158_s1 = inlined_call_operand.hbm [shape: f32[2,8,32], index: 1, kind: input, shape index: {}]   ;;  %s2159_s2 = inlined_call_operand.hbm [shape: f32[2,8,32], index: 2, kind: input, shape index: {}]   ;;  %s2160_s3 = inlined_call_operand.hbm [shape: bf16[3,32,32], index: 3, kind: input, shape index: {}]   ;;  %s2161_s4 = inlined_call_operand.hbm [shape: f32[3,1,32], index: 4, kind: input, shape index: {}]   ;;  %s2162_s5 = inlined_call_operand.vmem [shape: bf16[32,32], index: 5, kind: input, shape index: {}]   ;;  %s2163_s6 = inlined_call_operand.vmem [shape: f32[1,32], index: 6, kind: input, shape index: {}]   ;;  %s2164_s7 = inlined_call_operand.hbm [shape: f32[16,32], index: 7, kind: output, shape index: {}]  }
   0x1   :  { %13 = vsyncpa [#allocation6], 0 }
   0x2   :  { %14 = vsyncpa [#allocation9], 0 }
   0x3   :  { %15 = vsyncpa [#allocation4], 0  ;;  %s1820_s24 = smov [#allocation5]   ;;  %s1821_s26 = smov [#allocation8]  }
   0x4   :  { %s33_s25 = sshll.u32 %s1820_s24, 4  ;;  %s57_s27 = sshll.u32 %s1821_s26, 4  ;;  %s34_s25 = int_to_ptr.vmem [resolvable:$true] %s33_s25  ;;  %s1878_s27 = int_to_ptr.vmem [resolvable:$true] %s57_s27 }
   0x5   :  { %s1680_s30 = scalar_lea.hbm %s2158_s1, 256 }
   0x6   :  { %p1681_p0 = scmp.ne.s32.totalorder %s2158_s1, %s1680_s30  ;;  %p1684_p1 = scmp.lt.u32.totalorder %s1680_s30, %s2158_s1 }
   0x8   :  { %p1686_p2 = pnand %p1684_p1, %p1681_p0 }
   0xa   :  { %1689 = shalt.err (!%p1686_p2)
}
   0xb   :  { %s1690_s12 = scalar_lea.vmem %s34_s25, 256  ;;  %p1695_p4 = scmp.lt.s32.totalorder %s34_s25, %s34_s25 }
   0xc   :  { %p1691_p3 = scmp.ne.s32.totalorder %s34_s25, %s1690_s12  ;;  %p1696_p5 = scmp.lt.s32.totalorder %s1690_s12, %s1690_s12 }
   0xe   :  { %p1697_p6 = por %p1696_p5, %p1695_p4 }
  0x10   :  { %p1698_p7 = pnand %p1697_p6, %p1691_p3 }
  0x12   :  { %1701 = shalt.err (!%p1698_p7)
}
  0x13   :  { %s1822_s13 = smov 128   ;;  %s1823_s14 = smov 8  }
  0x14   :  { %39 = dma.hbm_to_vmem [thread:$0]  %s2158_s1, 256, %s34_s25, [#allocation6], %s1822_s13, %s1822_s13, %s1823_s14  }
  0x15   :  { %s1702_s19 = scalar_lea.hbm %s2160_s3, 768 }
  0x16   :  { %p1703_p8 = scmp.ne.s32.totalorder %s2160_s3, %s1702_s19  ;;  %p1706_p9 = scmp.lt.u32.totalorder %s1702_s19, %s2160_s3 }
  0x18   :  { %p1708_p10 = pnand %p1706_p9, %p1703_p8 }
  0x1a   :  { %1711 = shalt.err (!%p1708_p10)
}
  0x1b   :  { %s1712_s24 = scalar_lea.vmem %s1878_s27, 768  ;;  %p1717_p12 = scmp.lt.s32.totalorder %s1878_s27, %s1878_s27 }
  0x1c   :  { %p1713_p11 = scmp.ne.s32.totalorder %s1878_s27, %s1712_s24  ;;  %p1718_p13 = scmp.lt.s32.totalorder %s1712_s24, %s1712_s24 }
  0x1e   :  { %p1719_p0 = por %p1718_p13, %p1717_p12 }
  0x20   :  { %p1720_p1 = pnand %p1719_p0, %p1713_p11 }
  0x22   :  { %1723 = shalt.err (!%p1720_p1)
}
  0x23   :  { %s1824_s1 = smov 64   ;;  %s1825_s25 = smov 4  }
  0x24   :  { %63 = dma.hbm_to_vmem [thread:$0]  %s2160_s3, 768, %s1878_s27, [#allocation9], %s1824_s1, %s1824_s1, %s1825_s25  }
  0x25   :  { %s1826_s29 = smov [#allocation2]   ;;  %s1827_s8 = smov [#allocation7]  }
  0x26   :  { %s21_s30 = sshll.u32 %s1826_s29, 4  ;;  %s45_s9 = sshll.u32 %s1827_s8, 4  ;;  %s22_s30 = int_to_ptr.vmem [resolvable:$true] %s21_s30  ;;  %s1912_s9 = int_to_ptr.vmem [resolvable:$true] %s45_s9 }
  0x27   :  { %s1724_s12 = scalar_lea.hbm %s2157_s0, 256 }
  0x28   :  { %p1725_p2 = scmp.ne.s32.totalorder %s2157_s0, %s1724_s12  ;;  %p1728_p3 = scmp.lt.u32.totalorder %s1724_s12, %s2157_s0 }
  0x2a   :  { %p1730_p4 = pnand %p1728_p3, %p1725_p2 }
  0x2c   :  { %1733 = shalt.err (!%p1730_p4)
}
  0x2d   :  { %s1734_s3 = scalar_lea.vmem %s22_s30, 256  ;;  %p1739_p6 = scmp.lt.s32.totalorder %s22_s30, %s22_s30 }
  0x2e   :  { %p1735_p5 = scmp.ne.s32.totalorder %s22_s30, %s1734_s3  ;;  %p1740_p7 = scmp.lt.s32.totalorder %s1734_s3, %s1734_s3 }
  0x30   :  { %p1741_p8 = por %p1740_p7, %p1739_p6 }
  0x32   :  { %p1742_p9 = pnand %p1741_p8, %p1735_p5 }
  0x34   :  { %1745 = shalt.err (!%p1742_p9)
}
  0x35   :  { %27 = dma.hbm_to_vmem [thread:$0]  %s2157_s0, 256, %s22_s30, [#allocation3], %s1822_s13, %s1822_s13, %s1823_s14  }
  0x36   :  { %s1746_s22 = scalar_lea.hbm %s2159_s2, 256 }
  0x37   :  { %p1747_p10 = scmp.ne.s32.totalorder %s2159_s2, %s1746_s22  ;;  %p1750_p11 = scmp.lt.u32.totalorder %s1746_s22, %s2159_s2 }
  0x39   :  { %p1752_p12 = pnand %p1750_p11, %p1747_p10 }
  0x3b   :  { %1755 = shalt.err (!%p1752_p12)
}
  0x3c   :  { %s1756_s26 = scalar_lea.vmem %s1912_s9, 256  ;;  %p1761_p0 = scmp.lt.s32.totalorder %s1912_s9, %s1912_s9 }
  0x3d   :  { %p1757_p13 = scmp.ne.s32.totalorder %s1912_s9, %s1756_s26  ;;  %p1762_p1 = scmp.lt.s32.totalorder %s1756_s26, %s1756_s26 }
  0x3f   :  { %p1763_p2 = por %p1762_p1, %p1761_p0 }
  0x41   :  { %p1764_p3 = pnand %p1763_p2, %p1757_p13 }
  0x43   :  { %1767 = shalt.err (!%p1764_p3)
}
  0x44   :  { %51 = dma.hbm_to_vmem [thread:$0]  %s2159_s2, 256, %s1912_s9, [#allocation6], %s1822_s13, %s1822_s13, %s1823_s14  }
  0x45   :  { %s1828_s29 = smov [#allocation10]   ;;  %s1768_s11 = scalar_lea.hbm %s2161_s4, 48 }
  0x46   :  { %s69_s30 = sshll.u32 %s1828_s29, 4  ;;  %p1769_p4 = scmp.ne.s32.totalorder %s2161_s4, %s1768_s11  ;;  %s70_s30 = int_to_ptr.vmem [resolvable:$true] %s69_s30 }
  0x47   :  { %p1772_p5 = scmp.lt.u32.totalorder %s1768_s11, %s2161_s4 }
  0x49   :  { %p1774_p6 = pnand %p1772_p5, %p1769_p4 }
  0x4b   :  { %1777 = shalt.err (!%p1774_p6)
}
  0x4c   :  { %s1778_s18 = scalar_lea.vmem %s70_s30, 48  ;;  %s1782_s2 = scalar_lea.vmem %s70_s30, 64 }
  0x4d   :  { %p1779_p7 = scmp.ne.s32.totalorder %s70_s30, %s1778_s18  ;;  %p1783_p8 = scmp.lt.s32.totalorder %s70_s30, %s70_s30 }
  0x4e   :  { %p1784_p9 = scmp.lt.s32.totalorder %s1782_s2, %s1778_s18 }
  0x50   :  { %p1785_p10 = por %p1784_p9, %p1783_p8 }
  0x52   :  { %p1786_p11 = pnand %p1785_p10, %p1779_p7 }
  0x54   :  { %1789 = shalt.err (!%p1786_p11)
}
  0x55   :  { %s1829_s9 = smov 16   ;;  %s1830_s3 = smov 1  }
  0x56   :  { %75 = dma.hbm_to_vmem [thread:$0]  %s2161_s4, 48, %s70_s30, [#allocation9], %s1829_s9, %s1829_s9, %s1830_s3  }
  0x57   :  { %1812 = dma.done.wait [#allocation3], 256  }
  0x58   :  { %1813 = vsyncadd [#allocation3], 4294967040 }
  0x59   :  { %1814 = dma.done.wait [#allocation6], 512  }
  0x5a   :  { %1815 = vsyncadd [#allocation6], 4294966784 }
  0x5b   :  { %1816 = dma.done.wait [#allocation9], 816  }
  0x5c   :  { %1817 = vsyncadd [#allocation9], 4294966480  ;;  %v1831_v0 = vmov 0.0   ;;  %vm1832_vm0 = vmmov 0   ;;  %v1640_v1 = vld [vmem:[#allocation8 + $0x10] sm:$0xff]   ;;  %v1641_v2 = vld [vmem:[#allocation8] sm:$0xff]  }
  0x5d   :  { %1442 = vmatprep.subr.bf16.mxu1 %v1831_v0  ;;  %1434 = vmatprep.subr.bf16.mxu0 %v1831_v0  ;;  %v1642_v3 = vld [vmem:[#allocation8 + $0x18] sm:$0xff]   ;;  %v99_v4 = vld [vmem:[#allocation5] sm:$0xff]  ;;  %v100_v5 = vld [vmem:[#allocation5 + $0x8] sm:$0xff]  ;;  %vm147_vm1 = vcmask 261120   ;;  %vm400_vm2 = vcmask 64512   ;;  %s1833_s4 = smov 112  }
  0x5e   :  { %1446 = vmatprep.mubr.msk.bf16.mxu1 %vm1832_vm0, %v1831_v0  ;;  %1438 = vmatprep.mubr.msk.bf16.mxu0 %vm1832_vm0, %v1831_v0  ;;  %v1643_v6 = vld [vmem:[#allocation8 + $0x8] sm:$0xff]   ;;  %v96_v7 = vld [vmem:[#allocation2] sm:$0xff]  ;;  %v101_v8 = vpack.c.bf16 %v100_v5, %v99_v4  ;;  %v97_v9 = vld [vmem:[#allocation2 + $0x8] sm:$0xff]  ;;  %s1834_s20 = smov 120   ;;  %s1835_s21 = smov 104   ;;  %vm876_vm3 = vcmask 1043456  }
  0x5f   :  { %1443 = vmatpush3.bf16.msra.mxu1 %v1640_v1  ;;  %1435 = vmatpush3.bf16.msra.mxu0 %v1641_v2  ;;  %v98_v10 = vpack.c.bf16 %v97_v9, %v96_v7  ;;  %v1644_v11 = vld [vmem:[#allocation8 + $0x20] sm:$0xff]   ;;  %v1645_v12 = vld [vmem:[#allocation8 + $0x28] sm:$0xff]   ;;  %v102_v13 = vld [vmem:[#allocation7] sm:$0xff]  ;;  %vm1268_vm4 = vcmask 130048   ;;  %vm1271_vm5 = vcmask 195584   ;;  %s1837_s0 = smov [#allocation11]  }
  0x60   :  { %1444 = vmatprep.subr.bf16.mxu1 %v1831_v0  ;;  %1436 = vmatprep.subr.bf16.mxu0 %v1831_v0  ;;  %v103_v14 = vld [vmem:[#allocation7 + $0x8] sm:$0xff]  ;;  %v1362_v16 = vld [vmem:[#allocation10 + $0x1] ss:$0 sm:$0xff]  ;;  %v1358_v17 = vld [vmem:[#allocation10] ss:$0 sm:$0xff]  ;;  %s1344_s28 = sshll.u32 %s1837_s0, 4  ;;  %s1345_s28 = int_to_ptr.vmem [resolvable:$true] %s1344_s28 }
  0x61   :  { %v104_v15 = vpack.c.bf16 %v103_v14, %v102_v13  ;;  %v1366_v4 = vld [vmem:[#allocation10 + $0x2] ss:$0 sm:$0xff]  ;;  %s1790_s29 = scalar_lea.vmem %s1345_s28, 256  ;;  %p1795_p13 = scmp.lt.s32.totalorder %s1345_s28, %s1345_s28 }
  0x62   :  { %p1791_p12 = scmp.ne.s32.totalorder %s1345_s28, %s1790_s29  ;;  %p1796_p0 = scmp.lt.s32.totalorder %s1790_s29, %s1790_s29 }
  0x63   :  { %1445 = vmatpush3.bf16.msra.mxu1 %v1642_v3  ;;  %1437 = vmatpush3.bf16.msra.mxu0 %v1643_v6 }
  0x64   :  { %1458 = vmatprep.subr.bf16.mxu1 %v1831_v0  ;;  %1450 = vmatprep.subr.bf16.mxu0 %v1831_v0  ;;  %p1797_p1 = por %p1796_p0, %p1795_p13 }
  0x66   :  { %1447 = vmatmul.mubr.msk.bf16.vlgmr.msra.gmra.mrb[0].mxu1 %vm147_vm1, %v101_v8  ;;  %1439 = vmatmul.mubr.msk.bf16.vlgmr.msra.gmra.mrb[0].mxu0 %vm147_vm1, %v98_v10  ;;  %p1798_p2 = pnand %p1797_p1, %p1791_p12 }
  0x67   :  { %1460 = vmatprep.mubr.msk.bf16.mxu1 %vm1832_vm0, %v1831_v0  ;;  %1451 = vmatpush3.bf16.msra.mxu0 %v1644_v11 }
  0x68   :  { %1454 = vmatprep.mubr.msk.bf16.mxu0 %vm1832_vm0, %v1831_v0  ;;  %1452 = vmatprep.subr.bf16.mxu0 %v1831_v0 }
  0x6b   :  { %1453 = vmatpush3.bf16.msra.mxu0 %v1645_v12 }
  0x6c   :  { %1464 = vmatprep.subr.bf16.mxu0 %v1831_v0 }
  0x6e   :  { %1455 = vmatmul.mubr.msk.bf16.vlgmr.msra.gmra.mrb[4].mxu0 %vm147_vm1, %v104_v15 }
  0x6f   :  { %1466 = vmatprep.mubr.msk.bf16.mxu0 %vm1832_vm0, %v1831_v0 }
 0x139   :  { %v247_v18 = vpop.f32.mrb[0].mxu1  ;;  %v185_v21 = vpop.f32.mrb[0].mxu0 }
 0x13a   :  { %v248_v19 = vadd.f32 %v1362_v16, %v247_v18  ;;  %v1448_v20 = vpop.f32.mrb[1].mxu1  ;;  %v186_v23 = vadd.f32 %v1358_v17, %v185_v21  ;;  %v1440_v24 = vpop.f32.mrb[1].mxu0 }
 0x13b   :  { %v250_v22 = vpop.f32.mrb[2].mxu1  ;;  %v188_v27 = vpop.f32.mrb[2].mxu0 }
 0x13c   :  { %v251_v25 = vadd.f32 %v1362_v16, %v250_v22  ;;  %v1449_v26 = vpop.f32.mrb[3].mxu1  ;;  %v364_v28 = vpack.c.bf16 %v248_v19, %v248_v19  ;;  %v189_v29 = vadd.f32 %v1358_v17, %v188_v27  ;;  %v1441_v30 = vpop.f32.mrb[3].mxu0  ;;  %v336_v36 = vpack.c.bf16 %v186_v23, %v186_v23 }
 0x13e   :  { %v405_v31 = vsel %vm400_vm2, %v364_v28, 0  ;;  %v1590_v32 = vpack.i.bf16 %v251_v25, %v248_v19  ;;  %v365_v33 = vpack.c.bf16 %v251_v25, %v251_v25  ;;  %v1595_v34 = vpack.i.bf16 %v189_v29, %v186_v23 }
 0x13f   :  { %1459 = vmatpush3.bf16.xpose.msra.mxu1 %v405_v31  ;;  %v337_v37 = vpack.c.bf16 %v189_v29, %v189_v29 }
 0x140   :  { %1591 = vrot.lane.b32.xlu1 %v1590_v32, %s1833_s4  ;;  %1581 = vrot.lane.b32.xlu0 %v1590_v32, %s1834_s20  ;;  %v451_v35 = vsel %vm400_vm2, %v365_v33, 0 }
 0x141   :  { %1465 = vmatpush3.bf16.xpose.msra.mxu0 %v451_v35  ;;  %1470 = vmatprep.subr.bf16.mxu1 %v1831_v0  ;;  %v309_v38 = vpop.f32.mrb[4].mxu0 }
 0x142   :  { %1476 = vmatprep.subr.bf16.mxu0 %v1831_v0  ;;  %v1456_v39 = vpop.f32.mrb[5].mxu0  ;;  %v2014_v8 = vadd.f32 %v1366_v4, %v309_v38 }
 0x143   :  { %v312_v40 = vpop.f32.mrb[6].mxu0 }
 0x144   :  { %1596 = vrot.lane.b32.xlu1 %v1595_v34, %s1833_s4  ;;  %1586 = vrot.lane.b32.xlu0 %v1595_v34, %s1834_s20  ;;  %v1457_v41 = vpop.f32.mrb[7].mxu0  ;;  %v2016_v11 = vadd.f32 %v1366_v4, %v312_v40  ;;  %v392_v15 = vpack.c.bf16 %v2014_v8, %v2014_v8 }
 0x146   :  { %1461 = vmatmul.mubr.msk.bf16.vlgmr.msra.gmra.mrb[4].mxu1 %vm400_vm2, %v336_v36  ;;  %v393_v17 = vpack.c.bf16 %v2016_v11, %v2016_v11  ;;  %v878_v19 = vsel %vm876_vm3, %v392_v15, 0 }
 0x147   :  { %1472 = vmatprep.mubr.msk.bf16.mxu1 %vm1832_vm0, %v1831_v0 }
 0x148   :  { %1606 = vrot.lane.b32.xlu1 %v1595_v34, %s1835_s21  ;;  %1601 = vrot.lane.b32.xlu0 %v1590_v32, %s1835_s21  ;;  %v924_v21 = vsel %vm876_vm3, %v393_v17, 0 }
 0x149   :  { %1467 = vmatmul.mubr.msk.bf16.vlgmr.msra.gmra.mrb[8].mxu0 %vm400_vm2, %v337_v37 }
 0x14a   :  { %1478 = vmatprep.mubr.msk.bf16.mxu0 %vm1832_vm0, %v1831_v0 }
 0x1b2   :  { %v1582_v42 = vpop.permute.xlu0 %1581  ;;  %v1592_v45 = vpop.permute.xlu1 %1591 }
 0x1b3   :  { %v1584_v43 = vunpack.i.h.bf16 %v1582_v42  ;;  %v1583_v44 = vunpack.i.l.bf16 %v1582_v42  ;;  %v1593_v49 = vunpack.i.l.bf16 %v1592_v45  ;;  %v1594_v52 = vunpack.i.h.bf16 %v1592_v45 }
 0x1b5   :  { %v367_v46 = vpack.c.bf16 %v1584_v43, %v1584_v43  ;;  %v366_v47 = vpack.c.bf16 %v1583_v44, %v1583_v44  ;;  %v368_v55 = vpack.c.bf16 %v1593_v49, %v1593_v49  ;;  %v369_v56 = vpack.c.bf16 %v1594_v52, %v1594_v52 }
 0x1b6   :  { %v1587_v48 = vpop.permute.xlu0 %1586  ;;  %v1597_v62 = vpop.permute.xlu1 %1596 }
 0x1b7   :  { %v497_v50 = vsel %vm400_vm2, %v366_v47, 0  ;;  %v543_v51 = vsel %vm400_vm2, %v367_v46, 0  ;;  %v1588_v53 = vunpack.i.l.bf16 %v1587_v48  ;;  %v1589_v54 = vunpack.i.h.bf16 %v1587_v48 }
 0x1b8   :  { %1471 = vmatpush3.bf16.xpose.msra.mxu1 %v497_v50  ;;  %1477 = vmatpush3.bf16.xpose.msra.mxu0 %v543_v51  ;;  %v589_v61 = vsel %vm400_vm2, %v368_v55, 0  ;;  %v635_v1 = vsel %vm400_vm2, %v369_v56, 0  ;;  %v1598_v2 = vunpack.i.l.bf16 %v1597_v62  ;;  %v1599_v3 = vunpack.i.h.bf16 %v1597_v62 }
 0x1b9   :  { %1482 = vmatprep.subr.bf16.mxu1 %v1831_v0  ;;  %1488 = vmatprep.subr.bf16.mxu0 %v1831_v0  ;;  %v338_v58 = vpack.c.bf16 %v1588_v53, %v1588_v53  ;;  %v339_v59 = vpack.c.bf16 %v1589_v54, %v1589_v54 }
 0x1ba   :  { %v1602_v57 = vpop.permute.xlu0 %1601  ;;  %v340_v7 = vpack.c.bf16 %v1598_v2, %v1598_v2  ;;  %v341_v9 = vpack.c.bf16 %v1599_v3, %v1599_v3  ;;  %v1607_v10 = vpop.permute.xlu1 %1606 }
 0x1bb   :  { %v1603_v60 = vunpack.i.l.bf16 %v1602_v57  ;;  %v1604_v63 = vunpack.i.h.bf16 %v1602_v57  ;;  %v1608_v14 = vunpack.i.l.bf16 %v1607_v10  ;;  %v1609_v16 = vunpack.i.h.bf16 %v1607_v10 }
 0x1bc   :  { %v2054_v10 = vpack.i.bf16 %v2016_v11, %v2014_v8 }
 0x1bd   :  { %v370_v5 = vpack.c.bf16 %v1603_v60, %v1603_v60  ;;  %v371_v6 = vpack.c.bf16 %v1604_v63, %v1604_v63  ;;  %v342_v18 = vpack.c.bf16 %v1608_v14, %v1608_v14  ;;  %v343_v20 = vpack.c.bf16 %v1609_v16, %v1609_v16 }
 0x1bf   :  { %1473 = vmatmul.mubr.msk.bf16.vlgmr.msra.gmra.mrb[8].mxu1 %vm400_vm2, %v338_v58  ;;  %1479 = vmatmul.mubr.msk.bf16.vlgmr.msra.gmra.mrb[12].mxu0 %vm400_vm2, %v339_v59  ;;  %v681_v12 = vsel %vm400_vm2, %v370_v5, 0  ;;  %v727_v13 = vsel %vm400_vm2, %v371_v6, 0 }
 0x1c0   :  { %1483 = vmatpush3.bf16.xpose.msra.mxu1 %v589_v61  ;;  %1489 = vmatpush3.bf16.xpose.msra.mxu0 %v635_v1 }
 0x1c1   :  { %1484 = vmatprep.mubr.msk.bf16.mxu1 %vm1832_vm0, %v1831_v0  ;;  %1490 = vmatprep.mubr.msk.bf16.mxu0 %vm1832_vm0, %v1831_v0 }
 0x1c2   :  { %1494 = vmatprep.subr.bf16.mxu1 %v1831_v0  ;;  %1500 = vmatprep.subr.bf16.mxu0 %v1831_v0 }
 0x1c7   :  { %1485 = vmatmul.mubr.msk.bf16.vlgmr.msra.gmra.mrb[12].mxu1 %vm400_vm2, %v340_v7  ;;  %1491 = vmatmul.mubr.msk.bf16.vlgmr.msra.gmra.mrb[16].mxu0 %vm400_vm2, %v341_v9 }
 0x1c8   :  { %1495 = vmatpush3.bf16.xpose.msra.mxu1 %v681_v12  ;;  %1501 = vmatpush3.bf16.xpose.msra.mxu0 %v727_v13 }
 0x1c9   :  { %1496 = vmatprep.mubr.msk.bf16.mxu1 %vm1832_vm0, %v1831_v0  ;;  %1502 = vmatprep.mubr.msk.bf16.mxu0 %vm1832_vm0, %v1831_v0 }
 0x1ca   :  { %1506 = vmatprep.subr.bf16.mxu1 %v1831_v0  ;;  %1512 = vmatprep.subr.bf16.mxu0 %v1831_v0 }
 0x1cf   :  { %1497 = vmatmul.mubr.msk.bf16.vlgmr.msra.gmra.mrb[16].mxu1 %vm400_vm2, %v342_v18  ;;  %1503 = vmatmul.mubr.msk.bf16.vlgmr.msra.gmra.mrb[20].mxu0 %vm400_vm2, %v343_v20 }
 0x1d0   :  { %1507 = vmatpush3.bf16.msra.mxu1 %v878_v19  ;;  %1513 = vmatpush3.bf16.msra.mxu0 %v924_v21 }
 0x1d1   :  { %1508 = vmatprep.mubr.msk.bf16.mxu1 %vm1832_vm0, %v1831_v0  ;;  %1518 = vmatprep.subr.bf16.mxu1 %v1831_v0 }
 0x1d2   :  { %1514 = vmatprep.mubr.msk.bf16.mxu0 %vm1832_vm0, %v1831_v0  ;;  %1524 = vmatprep.subr.bf16.mxu0 %v1831_v0 }
 0x219   :  { %v441_v22 = vpop.f32.mrb[4].mxu1 }
 0x21a   :  { %v1462_v23 = vpop.f32.mrb[5].mxu1  ;;  %v769_v24 = vsel %vm400_vm2, %v441_v22, -inf }
 0x21b   :  { %v444_v25 = vpop.f32.mrb[6].mxu1  ;;  %770 = vmax.xlane.f32.xlu0 %v769_v24 }
 0x21c   :  { %v487_v26 = vpop.f32.mrb[8].mxu0  ;;  %v1463_v27 = vpop.f32.mrb[7].mxu1 }
 0x21d   :  { %v1468_v28 = vpop.f32.mrb[9].mxu0  ;;  %v772_v29 = vsel %vm400_vm2, %v487_v26, -inf }
 0x21e   :  { %773 = vmax.xlane.f32.xlu1 %v772_v29  ;;  %v490_v30 = vpop.f32.mrb[10].mxu0 }
 0x21f   :  { %v1469_v31 = vpop.f32.mrb[11].mxu0 }
 0x292   :  { %v533_v32 = vpop.f32.mrb[8].mxu1  ;;  %v579_v33 = vpop.f32.mrb[12].mxu0 }
 0x293   :  { %v1474_v34 = vpop.f32.mrb[9].mxu1  ;;  %v775_v35 = vsel %vm400_vm2, %v533_v32, -inf  ;;  %v1480_v36 = vpop.f32.mrb[13].mxu0  ;;  %v778_v41 = vsel %vm400_vm2, %v579_v33, -inf }
 0x294   :  { %776 = vmax.xlane.f32.xlu0 %v775_v35  ;;  %v536_v37 = vpop.f32.mrb[10].mxu1  ;;  %v582_v38 = vpop.f32.mrb[14].mxu0 }
 0x295   :  { %v1475_v39 = vpop.f32.mrb[11].mxu1  ;;  %v1481_v40 = vpop.f32.mrb[15].mxu0 }
 0x298   :  { %779 = vmax.xlane.f32.xlu0 %v778_v41 }
 0x29a   :  { %v625_v42 = vpop.f32.mrb[12].mxu1  ;;  %v671_v43 = vpop.f32.mrb[16].mxu0 }
 0x29b   :  { %v1486_v44 = vpop.f32.mrb[13].mxu1  ;;  %v781_v45 = vsel %vm400_vm2, %v625_v42, -inf  ;;  %v1492_v46 = vpop.f32.mrb[17].mxu0  ;;  %v784_v48 = vsel %vm400_vm2, %v671_v43, -inf }
 0x29c   :  { %v628_v47 = vpop.f32.mrb[14].mxu1  ;;  %782 = vmax.xlane.f32.xlu1 %v781_v45  ;;  %785 = vmax.xlane.f32.xlu0 %v784_v48  ;;  %v674_v49 = vpop.f32.mrb[18].mxu0 }
 0x29d   :  { %v1487_v50 = vpop.f32.mrb[15].mxu1  ;;  %v1493_v51 = vpop.f32.mrb[19].mxu0 }
 0x2a2   :  { %v717_v52 = vpop.f32.mrb[16].mxu1  ;;  %v763_v53 = vpop.f32.mrb[20].mxu0 }
 0x2a3   :  { %v1498_v54 = vpop.f32.mrb[17].mxu1  ;;  %v787_v55 = vsel %vm400_vm2, %v717_v52, -inf  ;;  %v1504_v56 = vpop.f32.mrb[21].mxu0  ;;  %v790_v58 = vsel %vm400_vm2, %v763_v53, -inf }
 0x2a4   :  { %v720_v57 = vpop.f32.mrb[18].mxu1  ;;  %788 = vmax.xlane.f32.xlu1 %v787_v55  ;;  %791 = vmax.xlane.f32.xlu0 %v790_v58  ;;  %v766_v59 = vpop.f32.mrb[22].mxu0 }
 0x2a5   :  { %v1499_v60 = vpop.f32.mrb[19].mxu1  ;;  %v1505_v61 = vpop.f32.mrb[23].mxu0 }
 0x2a8   :  { %v771_v62 = vpop.xlane.xlu0 %770 }
 0x2a9   :  { %v793_v63 = vsub.f32 %v441_v22, %v771_v62 }
 0x2ab   :  { %v801_v1 = vmul.f32 1.442695, %v793_v63  ;;  %v774_v2 = vpop.xlane.xlu1 %773 }
 0x2ac   :  { %v794_v3 = vsub.f32 %v487_v26, %v774_v2 }
 0x2ad   :  { %1648 = vpow2.f32 %v801_v1 }
 0x2ae   :  { %v803_v4 = vmul.f32 1.442695, %v794_v3 }
 0x2b0   :  { %1650 = vpow2.f32 %v803_v4 }
 0x2b7   :  { %v1649_v5 = vpop.eup %1648 }
 0x2b8   :  { %v817_v6 = vsel %vm400_vm2, %v1649_v5, 0.0 }
 0x2b9   :  { %818 = vadd.xlane.f32.xlu1 %v817_v6 }
 0x2ba   :  { %v1651_v7 = vpop.eup %1650 }
 0x2bb   :  { %v820_v9 = vsel %vm400_vm2, %v1651_v7, 0.0 }
 0x2bc   :  { %821 = vadd.xlane.f32.xlu0 %v820_v9 }
 0x2ca   :  { %1611 = vrot.lane.b32.xlu1 %v2054_v10, %s1834_s20 }
 0x321   :  { %v777_v12 = vpop.xlane.xlu0 %776 }
 0x322   :  { %v795_v13 = vsub.f32 %v533_v32, %v777_v12 }
 0x324   :  { %v805_v14 = vmul.f32 1.442695, %v795_v13 }
 0x325   :  { %v780_v15 = vpop.xlane.xlu0 %779 }
 0x326   :  { %1652 = vpow2.f32 %v805_v14  ;;  %v796_v16 = vsub.f32 %v579_v33, %v780_v15 }
 0x328   :  { %v807_v17 = vmul.f32 1.442695, %v796_v16 }
 0x329   :  { %v783_v18 = vpop.xlane.xlu1 %782  ;;  %v786_v20 = vpop.xlane.xlu0 %785 }
 0x32a   :  { %1654 = vpow2.f32 %v807_v17  ;;  %v797_v19 = vsub.f32 %v625_v42, %v783_v18  ;;  %v798_v21 = vsub.f32 %v671_v43, %v786_v20 }
 0x32c   :  { %v809_v22 = vmul.f32 1.442695, %v797_v19  ;;  %v811_v23 = vmul.f32 1.442695, %v798_v21 }
 0x32e   :  { %1656 = vpow2.f32 %v809_v22 }
 0x32f   :  { %1658 = vpow2.f32 %v811_v23 }
 0x330   :  { %v2058_v8 = vpop.eup %1652 }
 0x331   :  { %v789_v11 = vpop.xlane.xlu1 %788  ;;  %v823_v24 = vsel %vm400_vm2, %v2058_v8, 0.0  ;;  %v792_v26 = vpop.xlane.xlu0 %791 }
 0x332   :  { %v799_v25 = vsub.f32 %v717_v52, %v789_v11  ;;  %824 = vadd.xlane.f32.xlu1 %v823_v24  ;;  %v800_v27 = vsub.f32 %v763_v53, %v792_v26 }
 0x334   :  { %v2062_v28 = vpop.eup %1654  ;;  %v813_v29 = vmul.f32 1.442695, %v799_v25  ;;  %v815_v30 = vmul.f32 1.442695, %v800_v27 }
 0x335   :  { %v826_v31 = vsel %vm400_vm2, %v2062_v28, 0.0 }
 0x336   :  { %1660 = vpow2.f32 %v813_v29  ;;  %827 = vadd.xlane.f32.xlu0 %v826_v31 }
 0x337   :  { %1662 = vpow2.f32 %v815_v30 }
 0x338   :  { %v2066_v32 = vpop.eup %1656 }
 0x339   :  { %v2068_v33 = vpop.eup %1658  ;;  %v829_v34 = vsel %vm400_vm2, %v2066_v32, 0.0 }
 0x33a   :  { %830 = vadd.xlane.f32.xlu1 %v829_v34  ;;  %v832_v35 = vsel %vm400_vm2, %v2068_v33, 0.0 }
 0x33b   :  { %833 = vadd.xlane.f32.xlu0 %v832_v35 }
 0x340   :  { %v2074_v36 = vpop.eup %1660 }
 0x341   :  { %v2076_v37 = vpop.eup %1662  ;;  %v835_v38 = vsel %vm400_vm2, %v2074_v36, 0.0 }
 0x342   :  { %836 = vadd.xlane.f32.xlu1 %v835_v38  ;;  %v838_v39 = vsel %vm400_vm2, %v2076_v37, 0.0 }
 0x343   :  { %839 = vadd.xlane.f32.xlu0 %v838_v39 }
 0x346   :  { %v819_v40 = vpop.xlane.xlu1 %818 }
 0x347   :  { %v841_v41 = vadd.f32 1e-09, %v819_v40 }
 0x349   :  { %1664 = vrcp.f32 %v841_v41  ;;  %v822_v42 = vpop.xlane.xlu0 %821 }
 0x34a   :  { %v842_v43 = vadd.f32 1e-09, %v822_v42  ;;  %v1612_v44 = vpop.permute.xlu1 %1611 }
 0x34b   :  { %v1613_v45 = vunpack.i.l.bf16 %v1612_v44  ;;  %v1614_v47 = vunpack.i.h.bf16 %v1612_v44 }
 0x34c   :  { %1666 = vrcp.f32 %v842_v43 }
 0x34d   :  { %v394_v49 = vpack.c.bf16 %v1613_v45, %v1613_v45  ;;  %v395_v53 = vpack.c.bf16 %v1614_v47, %v1614_v47 }
 0x34f   :  { %v970_v54 = vsel %vm876_vm3, %v394_v49, 0  ;;  %v1016_v56 = vsel %vm876_vm3, %v395_v53, 0 }
 0x353   :  { %v1665_v46 = vpop.eup %1664  ;;  %1621 = vrot.lane.b32.xlu1 %v2054_v10, %s1835_s21 }
 0x354   :  { %v857_v48 = vmul.f32 %v1665_v46, %v1649_v5 }
 0x356   :  { %v1667_v50 = vpop.eup %1666  ;;  %v865_v51 = vpack.c.bf16 %v857_v48, %v857_v48 }
 0x357   :  { %v858_v52 = vmul.f32 %v1667_v50, %v1651_v7 }
 0x358   :  { %1509 = vmatmul.mubr.msk.bf16.vlgmr.msra.gmra.mrb[20].mxu1 %vm400_vm2, %v865_v51  ;;  %v1646_v51 = vld [vmem:[%s2162_s5] sm:$0xff]  }
 0x359   :  { %1519 = vmatpush3.bf16.msra.mxu1 %v970_v54  ;;  %v866_v55 = vpack.c.bf16 %v858_v52, %v858_v52  ;;  %1520 = vmatprep.mubr.msk.bf16.mxu1 %vm1832_vm0, %v1831_v0 }
 0x35a   :  { %1616 = vrot.lane.b32.xlu0 %v2054_v10, %s1833_s4  ;;  %1530 = vmatprep.subr.bf16.mxu1 %v1831_v0 }
 0x35b   :  { %1515 = vmatmul.mubr.msk.bf16.vlgmr.msra.gmra.mrb[24].mxu0 %vm400_vm2, %v866_v55 }
 0x35c   :  { %1525 = vmatpush3.bf16.msra.mxu0 %v1016_v56  ;;  %1526 = vmatprep.mubr.msk.bf16.mxu0 %vm1832_vm0, %v1831_v0  ;;  %v1647_v56 = vld [vmem:[%s2162_s5 + $0x8] sm:$0xff]   ;;  %s1836_s5 = smov 24  }
 0x35d   :  { %1536 = vmatprep.subr.bf16.mxu0 %v1831_v0 }
 0x3bf   :  { %v825_v57 = vpop.xlane.xlu1 %824 }
 0x3c0   :  { %v843_v58 = vadd.f32 1e-09, %v825_v57 }
 0x3c2   :  { %1668 = vrcp.f32 %v843_v58 }
 0x3c3   :  { %v828_v59 = vpop.xlane.xlu0 %827 }
 0x3c4   :  { %v844_v60 = vadd.f32 1e-09, %v828_v59 }
 0x3c6   :  { %1670 = vrcp.f32 %v844_v60 }
 0x3c7   :  { %v831_v61 = vpop.xlane.xlu1 %830 }
 0x3c8   :  { %v845_v62 = vadd.f32 1e-09, %v831_v61  ;;  %v834_v63 = vpop.xlane.xlu0 %833 }
 0x3c9   :  { %v846_v1 = vadd.f32 1e-09, %v834_v63 }
 0x3ca   :  { %1672 = vrcp.f32 %v845_v62 }
 0x3cb   :  { %1674 = vrcp.f32 %v846_v1 }
 0x3cc   :  { %v1669_v2 = vpop.eup %1668 }
 0x3cd   :  { %v859_v3 = vmul.f32 %v1669_v2, %v2058_v8 }
 0x3cf   :  { %v837_v4 = vpop.xlane.xlu1 %836  ;;  %v867_v5 = vpack.c.bf16 %v859_v3, %v859_v3 }
 0x3d0   :  { %v1671_v6 = vpop.eup %1670  ;;  %v847_v7 = vadd.f32 1e-09, %v837_v4  ;;  %v840_v9 = vpop.xlane.xlu0 %839 }
 0x3d1   :  { %v860_v10 = vmul.f32 %v1671_v6, %v2062_v28  ;;  %v848_v12 = vadd.f32 1e-09, %v840_v9  ;;  %1521 = vmatmul.mubr.msk.bf16.vlgmr.msra.gmra.mrb[24].mxu1 %vm400_vm2, %v867_v5 }
 0x3d2   :  { %1676 = vrcp.f32 %v847_v7  ;;  %1532 = vmatprep.mubr.msk.bf16.mxu1 %vm1832_vm0, %v1831_v0 }
 0x3d3   :  { %1678 = vrcp.f32 %v848_v12  ;;  %v1622_v13 = vpop.permute.xlu1 %1621  ;;  %v868_v14 = vpack.c.bf16 %v860_v10, %v860_v10 }
 0x3d4   :  { %v1673_v15 = vpop.eup %1672  ;;  %v1617_v16 = vpop.permute.xlu0 %1616  ;;  %v1624_v18 = vunpack.i.h.bf16 %v1622_v13  ;;  %v1623_v19 = vunpack.i.l.bf16 %v1622_v13 }
 0x3d5   :  { %v1675_v17 = vpop.eup %1674  ;;  %v1619_v20 = vunpack.i.h.bf16 %v1617_v16  ;;  %v1618_v21 = vunpack.i.l.bf16 %v1617_v16  ;;  %1527 = vmatmul.mubr.msk.bf16.vlgmr.msra.gmra.mrb[28].mxu0 %vm400_vm2, %v868_v14  ;;  %v861_v22 = vmul.f32 %v1673_v15, %v2066_v32 }
 0x3d6   :  { %1538 = vmatprep.mubr.msk.bf16.mxu0 %vm1832_vm0, %v1831_v0  ;;  %v862_v23 = vmul.f32 %v1675_v17, %v2068_v33  ;;  %v399_v24 = vpack.c.bf16 %v1624_v18, %v1624_v18  ;;  %v398_v25 = vpack.c.bf16 %v1623_v19, %v1623_v19 }
 0x3d7   :  { %v397_v8 = vpack.c.bf16 %v1619_v20, %v1619_v20  ;;  %v396_v11 = vpack.c.bf16 %v1618_v21, %v1618_v21  ;;  %v869_v28 = vpack.c.bf16 %v861_v22, %v861_v22 }
 0x3d8   :  { %v870_v29 = vpack.c.bf16 %v862_v23, %v862_v23  ;;  %v1154_v32 = vsel %vm876_vm3, %v398_v25, 0  ;;  %v1200_v33 = vsel %vm876_vm3, %v399_v24, 0 }
 0x3d9   :  { %v1062_v26 = vsel %vm876_vm3, %v396_v11, 0  ;;  %v1108_v27 = vsel %vm876_vm3, %v397_v8, 0 }
 0x3da   :  { %1531 = vmatpush3.bf16.msra.mxu1 %v1062_v26  ;;  %1537 = vmatpush3.bf16.msra.mxu0 %v1108_v27  ;;  %v1386_v27 = vld [vmem:[%s2163_s6] ss:$0 sm:$0xff] }
 0x3db   :  { %1542 = vmatprep.subr.bf16.mxu1 %v1831_v0  ;;  %1548 = vmatprep.subr.bf16.mxu0 %v1831_v0 }
 0x3dc   :  { %v1677_v30 = vpop.eup %1676 }
 0x3dd   :  { %v1679_v31 = vpop.eup %1678  ;;  %1533 = vmatmul.mubr.msk.bf16.vlgmr.msra.gmra.mrb[28].mxu1 %vm400_vm2, %v869_v28  ;;  %1539 = vmatmul.mubr.msk.bf16.vlgmr.msra.gmra.mrb[32].mxu0 %vm400_vm2, %v870_v29  ;;  %v863_v34 = vmul.f32 %v1677_v30, %v2074_v36 }
 0x3de   :  { %1543 = vmatpush3.bf16.msra.mxu1 %v1154_v32  ;;  %1549 = vmatpush3.bf16.msra.mxu0 %v1200_v33  ;;  %v864_v35 = vmul.f32 %v1679_v31, %v2076_v37 }
 0x3df   :  { %1544 = vmatprep.mubr.msk.bf16.mxu1 %vm1832_vm0, %v1831_v0  ;;  %1550 = vmatprep.mubr.msk.bf16.mxu0 %vm1832_vm0, %v1831_v0  ;;  %v871_v38 = vpack.c.bf16 %v863_v34, %v863_v34 }
 0x3e0   :  { %1554 = vmatprep.subr.bf16.mxu1 %v1831_v0  ;;  %v872_v39 = vpack.c.bf16 %v864_v35, %v864_v35 }
 0x3e5   :  { %1545 = vmatmul.mubr.msk.bf16.vlgmr.msra.gmra.mrb[32].mxu1 %vm400_vm2, %v871_v38  ;;  %1551 = vmatmul.mubr.msk.bf16.vlgmr.msra.gmra.mrb[36].mxu0 %vm400_vm2, %v872_v39 }
 0x3e6   :  { %1558 = vmatprep.mubr.msk.bf16.mxu1 %vm1832_vm0, %v1831_v0  ;;  %1555 = vmatpush3.bf16.msra.mxu1 %v1646_v51 }
 0x3e7   :  { %1556 = vmatprep.subr.bf16.mxu1 %v1831_v0 }
 0x3ea   :  { %1557 = vmatpush3.bf16.msra.mxu1 %v1647_v56 }
 0x42b   :  { %v914_v36 = vpop.f32.mrb[20].mxu1 }
 0x42c   :  { %v1510_v40 = vpop.f32.mrb[21].mxu1 }
 0x42d   :  { %v917_v37 = vpop.f32.mrb[22].mxu1 }
 0x42e   :  { %v960_v41 = vpop.f32.mrb[24].mxu0  ;;  %v1511_v42 = vpop.f32.mrb[23].mxu1 }
 0x42f   :  { %v1516_v43 = vpop.f32.mrb[25].mxu0 }
 0x430   :  { %v963_v44 = vpop.f32.mrb[26].mxu0 }
 0x431   :  { %v1517_v45 = vpop.f32.mrb[27].mxu0 }
 0x4a4   :  { %v1006_v46 = vpop.f32.mrb[24].mxu1 }
 0x4a5   :  { %v1522_v47 = vpop.f32.mrb[25].mxu1 }
 0x4a6   :  { %v1009_v48 = vpop.f32.mrb[26].mxu1 }
 0x4a7   :  { %v1523_v49 = vpop.f32.mrb[27].mxu1 }
 0x4a8   :  { %v1052_v50 = vpop.f32.mrb[28].mxu0 }
 0x4a9   :  { %v1625_v52 = vpack.i.bf16 %v1052_v50, %v1006_v46  ;;  %v1528_v53 = vpop.f32.mrb[29].mxu0 }
 0x4aa   :  { %v1055_v54 = vpop.f32.mrb[30].mxu0 }
 0x4ab   :  { %1626 = vrot.lane.b32.xlu1 %v1625_v52, %s1823_s14  ;;  %v1529_v55 = vpop.f32.mrb[31].mxu0 }
 0x4b0   :  { %v1098_v57 = vpop.f32.mrb[28].mxu1  ;;  %v1144_v58 = vpop.f32.mrb[32].mxu0 }
 0x4b1   :  { %v1534_v59 = vpop.f32.mrb[29].mxu1  ;;  %v1630_v60 = vpack.i.bf16 %v1144_v58, %v1098_v57  ;;  %v1540_v61 = vpop.f32.mrb[33].mxu0 }
 0x4b2   :  { %v1101_v62 = vpop.f32.mrb[30].mxu1  ;;  %v1147_v63 = vpop.f32.mrb[34].mxu0 }
 0x4b3   :  { %v1535_v1 = vpop.f32.mrb[31].mxu1  ;;  %1631 = vrot.lane.b32.xlu0 %v1630_v60, %s1829_s9  ;;  %v1541_v2 = vpop.f32.mrb[35].mxu0 }
 0x4b8   :  { %v1190_v3 = vpop.f32.mrb[32].mxu1  ;;  %v1236_v4 = vpop.f32.mrb[36].mxu0 }
 0x4b9   :  { %v1546_v5 = vpop.f32.mrb[33].mxu1  ;;  %v1635_v0 = vpack.i.bf16 %v1236_v4, %v1190_v3  ;;  %v1552_v6 = vpop.f32.mrb[37].mxu0 }
 0x4ba   :  { %v1193_v7 = vpop.f32.mrb[34].mxu1  ;;  %v1239_v9 = vpop.f32.mrb[38].mxu0 }
 0x4bb   :  { %v1547_v10 = vpop.f32.mrb[35].mxu1  ;;  %1636 = vrot.lane.b32.xlu1 %v1635_v0, %s1836_s5  ;;  %v1553_v12 = vpop.f32.mrb[39].mxu0 }
 0x51d   :  { %v1627_v13 = vpop.permute.xlu1 %1626 }
 0x51e   :  { %v1629_v15 = vunpack.i.h.bf16 %v1627_v13  ;;  %v1628_v16 = vunpack.i.l.bf16 %v1627_v13 }
 0x520   :  { %v1267_v20 = vsel %vm400_vm2, %v960_v41, %v1629_v15  ;;  %v1266_v21 = vsel %vm400_vm2, %v914_v36, %v1628_v16 }
 0x525   :  { %v1632_v14 = vpop.permute.xlu0 %1631 }
 0x526   :  { %v1634_v17 = vunpack.i.h.bf16 %v1632_v14  ;;  %v1633_v18 = vunpack.i.l.bf16 %v1632_v14 }
 0x528   :  { %v1270_v8 = vsel %vm1268_vm4, %v1267_v20, %v1634_v17  ;;  %v1269_v11 = vsel %vm1268_vm4, %v1266_v21, %v1633_v18 }
 0x52d   :  { %v1637_v19 = vpop.permute.xlu1 %1636 }
 0x52e   :  { %v1639_v22 = vunpack.i.h.bf16 %v1637_v19  ;;  %v1638_v23 = vunpack.i.l.bf16 %v1637_v19 }
 0x530   :  { %v1273_v24 = vsel %vm1271_vm5, %v1270_v8, %v1639_v22  ;;  %v1272_v25 = vsel %vm1271_vm5, %v1269_v11, %v1638_v23 }
 0x531   :  { %v1274_v26 = vpack.c.bf16 %v1273_v24, %v1272_v25 }
 0x533   :  { %1559 = vmatmul.mubr.msk.bf16.vlgmr.msra.gmra.mrb[36].mxu1 %vm147_vm1, %v1274_v26 }
 0x606   :  { %v1330_v28 = vpop.f32.mrb[36].mxu1 }
 0x607   :  { %v1331_v29 = vadd.f32 %v1386_v27, %v1330_v28  ;;  %v1560_v30 = vpop.f32.mrb[37].mxu1 }
 0x608   :  { %v1333_v31 = vpop.f32.mrb[38].mxu1 }
 0x609   :  { %1337 = vst.msk [vmem:[#allocation11] sm:$0xff] %vm147_vm1, %v1331_v29  ;;  %v1334_v32 = vadd.f32 %v1386_v27, %v1333_v31  ;;  %v1561_v33 = vpop.f32.mrb[39].mxu1 }
 0x60b   :  { %1338 = vst.msk [vmem:[#allocation11 + $0x8] sm:$0xff] %vm147_vm1, %v1334_v32 }
 0x60c   :  { %1801 = shalt.err (!%p1798_p2)
}
 0x60d   :  { %s1802_s8 = scalar_lea.hbm %s2164_s7, 256 }
 0x60e   :  { %p1803_p3 = scmp.ne.s32.totalorder %s2164_s7, %s1802_s8  ;;  %p1806_p4 = scmp.lt.u32.totalorder %s1802_s8, %s2164_s7 }
 0x610   :  { %p1808_p5 = pnand %p1806_p4, %p1803_p3 }
 0x612   :  { %1811 = shalt.err (!%p1808_p5)
}
 0x613   :  { %1350 = dma.vmem_to_hbm [thread:$0]  %s1345_s28, 256, %s2164_s7, [#allocation4], %s1822_s13, %s1822_s13, %s1823_s14  }
 0x614   :  { %1818 = dma.done.wait [#allocation4], 256  }
 0x615   :  { %1819 = vsyncadd [#allocation4], 4294967040 }
 0x616   :  { %1354 = vsyncpa [#allocation3], 1 }
 0x617   :  { %1355 = vsyncpa [#allocation6], 1 }
 0x618   :  { %1356 = vsyncpa [#allocation9], 1 }
 0x619   :  { %1357 = vsyncpa [#allocation4], 1 }

</bundles_post_ra>
